<compile_context>
chip_gen: v7x
topology: tpu7x:2x2x1
jax: 0.10.0
libtpu: 0.0.40
codegen_flags: <defaults>
</compile_context>

<pallas_src>
import functools

import jax
import jax.numpy as jnp
from jax.experimental import pallas as pl
from jax.experimental.pallas import tpu as pltpu


def _rnn_kernel(x_ref, wh_ref, bh_ref, wo_ref, bo_ref, hseq_ref, h_ref, *,
                use_mxu):
    wh = wh_ref[...].astype(jnp.float32)    # (K, H)
    bh = bh_ref[...].astype(jnp.float32)    # (1, H)
    wo = wo_ref[...].astype(jnp.float32)    # (K, 1)
    bo = bo_ref[...].astype(jnp.float32)    # (1, 1)
    k_dim = x_ref.shape[1]
    m_tile = x_ref.shape[0]

    if use_mxu:
        # Contraction dim large enough for the MXU; accumulate in f32.
        x = x_ref[...].astype(jnp.float32)
        hs = jnp.dot(x, wh, preferred_element_type=jnp.float32) + bh
        ho = jnp.dot(x, wo, preferred_element_type=jnp.float32) + bo
        hseq_ref[...] = hs.astype(hseq_ref.dtype)
        h_ref[...] = jnp.tanh(ho).astype(h_ref.dtype)
        return

    # Tiny contraction dim: VPU broadcast multiply-adds.  Block the row dim
    # in <=128-row chunks so the f32 accumulators stay in vregs instead of
    # doing K load/fma/store sweeps over a tile-sized VMEM buffer.
    chunk = next(c for c in (128, 64, 32, 16, 8) if m_tile % c == 0)
    n_chunks = m_tile // chunk

    def body(c, carry):
        r = pl.multiple_of(c * chunk, chunk)
        xk = x_ref[pl.ds(r, chunk), :].astype(jnp.float32)   # (chunk, K)
        hs = bh
        ho = bo
        for k in range(k_dim):                                # static, K < 8
            xc = xk[:, k:k + 1]
            hs = hs + xc * wh[k:k + 1, :]
            ho = ho + xc * wo[k:k + 1, :]
        hseq_ref[pl.ds(r, chunk), :] = hs.astype(hseq_ref.dtype)
        # tanh only on the single i2o column.
        h_ref[pl.ds(r, chunk), :] = jnp.tanh(ho).astype(h_ref.dtype)
        return carry

    jax.lax.fori_loop(0, n_chunks, body, None, unroll=True)


def rnn_forward(x, w_i2h, b_i2h, w_i2o, b_i2o, *, m_tile=1024):
    """x: (seq_len, batch, input_size). Returns (h_seq, h) matching the
    PyTorch module: h_seq = i2h(x), h = tanh(i2o(x))."""
    seq_len, batch, input_size = x.shape
    hidden_size = w_i2h.shape[0]
    M = seq_len * batch
    dtype = x.dtype

    x2d = x.reshape(M, input_size)                   # contiguous reshape, no copy
    wh = w_i2h.T.astype(dtype)                       # (K, H)  tiny; folds under jit
    bh = b_i2h.reshape(1, hidden_size).astype(dtype)
    wo = w_i2o.T.astype(dtype)                       # (K, 1)
    bo = b_i2o.reshape(1, 1).astype(dtype)

    # Row tile: multiple of 8, no padding (Pallas masks the ragged last block),
    # aim for >=2 grid blocks (v7x megacore), clamp to a conservative ~8 MiB
    # double-buffered VMEM budget (fits v7x's smaller VMEM without tuning).
    target = min(m_tile, pl.cdiv(pl.cdiv(M, 2), 8) * 8)
    bytes_per_row = 8 * (input_size + hidden_size + 1)   # f32 * 2 buffers, in+out
    budget_rows = (8 * 1024 * 1024) // bytes_per_row
    m_tile_eff = max(8, min(target, (budget_rows // 8) * 8))
    grid = (pl.cdiv(M, m_tile_eff),)

    use_mxu = input_size >= 8

    h_seq2d, h2d = pl.pallas_call(
        functools.partial(_rnn_kernel, use_mxu=use_mxu),
        out_shape=(
            jax.ShapeDtypeStruct((M, hidden_size), dtype),
            jax.ShapeDtypeStruct((M, 1), dtype),
        ),
        grid=grid,
        in_specs=[
            pl.BlockSpec((m_tile_eff, input_size), lambda i: (i, 0)),
            pl.BlockSpec((input_size, hidden_size), lambda i: (0, 0)),  # VMEM-resident
            pl.BlockSpec((1, hidden_size), lambda i: (0, 0)),
            pl.BlockSpec((input_size, 1), lambda i: (0, 0)),
            pl.BlockSpec((1, 1), lambda i: (0, 0)),
        ],
        out_specs=(
            pl.BlockSpec((m_tile_eff, hidden_size), lambda i: (i, 0)),
            pl.BlockSpec((m_tile_eff, 1), lambda i: (i, 0)),
        ),
        compiler_params=pltpu.CompilerParams(
            dimension_semantics=("parallel",)),
    )(x2d, wh, bh, wo, bo)

    h_seq = h_seq2d.reshape(seq_len, batch, hidden_size)
    h = h2d.reshape(seq_len, batch, 1)
    return h_seq, h


def init_params(key, input_size, hidden_size):
    """Deterministic nn.Linear-style init (uniform +/- 1/sqrt(fan_in))."""
    k1, k2, k3, k4 = jax.random.split(key, 4)
    bound = 1.0 / jnp.sqrt(jnp.float32(input_size))
    w_i2h = jax.random.uniform(k1, (hidden_size, input_size), jnp.float32,
                               -bound, bound)
    b_i2h = jax.random.uniform(k2, (hidden_size,), jnp.float32, -bound, bound)
    w_i2o = jax.random.uniform(k3, (1, input_size), jnp.float32, -bound, bound)
    b_i2o = jax.random.uniform(k4, (1,), jnp.float32, -bound, bound)
    return w_i2h, b_i2h, w_i2o, b_i2o


if __name__ == "__main__":
    seq_len, batch, input_size, hidden_size = 8, 2, 1, 20

    key = jax.random.PRNGKey(0)
    kx, kp = jax.random.split(key)
    x = jax.random.normal(kx, (seq_len, batch, input_size), jnp.float32)
    w_i2h, b_i2h, w_i2o, b_i2o = init_params(kp, input_size, hidden_size)

    fwd = jax.jit(rnn_forward)
    h_seq, h = fwd(x, w_i2h, b_i2h, w_i2o, b_i2o)
    jax.block_until_ready((h_seq, h))

    # Reference check in plain JAX (same semantics as the PyTorch forward).
    h_seq_ref = x @ w_i2h.T + b_i2h
    h_ref = jnp.tanh(x @ w_i2o.T + b_i2o)
    assert h_seq.shape == (seq_len, batch, hidden_size)
    assert h.shape == (seq_len, batch, 1)
    assert jnp.allclose(h_seq, h_seq_ref, atol=1e-5)
    assert jnp.allclose(h, h_ref, atol=1e-5)

    print("KERNEL_OK")
</pallas_src>

<mosaic_0001>
module attributes {stable_mosaic.version = 11 : i64} {
  func.func @_rnn_kernel(%arg0: i32, %arg1: memref<8x1xf32, #tpu.memory_space<vmem>>, %arg2: memref<1x20xf32, #tpu.memory_space<vmem>>, %arg3: memref<1x20xf32, #tpu.memory_space<vmem>>, %arg4: memref<1x1xf32, #tpu.memory_space<vmem>>, %arg5: memref<1x1xf32, #tpu.memory_space<vmem>>, %arg6: memref<8x20xf32, #tpu.memory_space<vmem>>, %arg7: memref<8x1xf32, #tpu.memory_space<vmem>>) attributes {dimension_semantics = [#tpu.dimension_semantics<parallel>], iteration_bounds = array<i64: 2>, scalar_prefetch = 0 : i64, scratch_operands = 0 : i64, tpu.core_type = #tpu.core_type<tc>, window_params = [{transform_indices = @transform_0, window_bounds = array<i64: 8, 1>}, {pipeline_mode = #tpu.pipeline_mode<synchronous>, transform_indices = @transform_1, window_bounds = array<i64: 1, 20>}, {pipeline_mode = #tpu.pipeline_mode<synchronous>, transform_indices = @transform_2, window_bounds = array<i64: 1, 20>}, {pipeline_mode = #tpu.pipeline_mode<synchronous>, transform_indices = @transform_3, window_bounds = array<i64: 1, 1>}, {pipeline_mode = #tpu.pipeline_mode<synchronous>, transform_indices = @transform_4, window_bounds = array<i64: 1, 1>}, {transform_indices = @transform_5, window_bounds = array<i64: 8, 20>}, {transform_indices = @transform_6, window_bounds = array<i64: 8, 1>}]} {
    %c0 = arith.constant 0 : index
    %c0_0 = arith.constant 0 : index
    %0 = vector.load %arg2[%c0, %c0_0] : memref<1x20xf32, #tpu.memory_space<vmem>>, vector<1x20xf32>
    %c0_1 = arith.constant 0 : index
    %c0_2 = arith.constant 0 : index
    %1 = vector.load %arg3[%c0_1, %c0_2] : memref<1x20xf32, #tpu.memory_space<vmem>>, vector<1x20xf32>
    %c0_3 = arith.constant 0 : index
    %c0_4 = arith.constant 0 : index
    %2 = vector.load %arg4[%c0_3, %c0_4] : memref<1x1xf32, #tpu.memory_space<vmem>>, vector<1x1xf32>
    %c0_5 = arith.constant 0 : index
    %c0_6 = arith.constant 0 : index
    %3 = vector.load %arg5[%c0_5, %c0_6] : memref<1x1xf32, #tpu.memory_space<vmem>>, vector<1x1xf32>
    %c0_i32 = arith.constant 0 : i32
    %c8_i32 = arith.constant 8 : i32
    %4 = arith.muli %c0_i32, %c8_i32 : i32
    %5 = tpu.assume_multiple %4, 8 : i32
    %6 = arith.index_cast %5 : i32 to index
    %c0_7 = arith.constant 0 : index
    %7 = vector.load %arg1[%6, %c0_7] : memref<8x1xf32, #tpu.memory_space<vmem>>, vector<8x1xf32>
    %8 = vector.broadcast %7 : vector<8x1xf32> to vector<8x20xf32>
    %9 = vector.broadcast %0 : vector<1x20xf32> to vector<8x20xf32>
    %10 = arith.mulf %8, %9 : vector<8x20xf32>
    %11 = vector.broadcast %1 : vector<1x20xf32> to vector<8x20xf32>
    %12 = arith.addf %11, %10 : vector<8x20xf32>
    %13 = vector.broadcast %2 : vector<1x1xf32> to vector<8x1xf32>
    %14 = arith.mulf %7, %13 : vector<8x1xf32>
    %15 = vector.broadcast %3 : vector<1x1xf32> to vector<8x1xf32>
    %16 = arith.addf %15, %14 : vector<8x1xf32>
    %17 = arith.index_cast %5 : i32 to index
    %c0_8 = arith.constant 0 : index
    %18 = vector.load %arg6[%17, %c0_8] : memref<8x20xf32, #tpu.memory_space<vmem>>, vector<8x20xf32>
    tpu.vector_store %arg6[%17, %c0_8], %12 {strides = array<i32>} : memref<8x20xf32, #tpu.memory_space<vmem>>, vector<8x20xf32>,
    %19 = math.tanh %16 : vector<8x1xf32>
    %20 = arith.index_cast %5 : i32 to index
    %c0_9 = arith.constant 0 : index
    %21 = vector.load %arg7[%20, %c0_9] : memref<8x1xf32, #tpu.memory_space<vmem>>, vector<8x1xf32>
    tpu.vector_store %arg7[%20, %c0_9], %19 {strides = array<i32>} : memref<8x1xf32, #tpu.memory_space<vmem>>, vector<8x1xf32>,
    %c1_i32 = arith.constant 1 : i32
    return
  }
  func.func @transform_0(%arg0: i32) -> (i32, i32) {
    %c0_i32 = arith.constant 0 : i32
    %c0_i32_0 = arith.constant 0 : i32
    return %arg0, %c0_i32 : i32, i32
  }
  func.func @transform_1(%arg0: i32) -> (i32, i32) {
    %c0_i32 = arith.constant 0 : i32
    %c0_i32_0 = arith.constant 0 : i32
    %c0_i32_1 = arith.constant 0 : i32
    return %c0_i32, %c0_i32_0 : i32, i32
  }
  func.func @transform_2(%arg0: i32) -> (i32, i32) {
    %c0_i32 = arith.constant 0 : i32
    %c0_i32_0 = arith.constant 0 : i32
    %c0_i32_1 = arith.constant 0 : i32
    return %c0_i32, %c0_i32_0 : i32, i32
  }
  func.func @transform_3(%arg0: i32) -> (i32, i32) {
    %c0_i32 = arith.constant 0 : i32
    %c0_i32_0 = arith.constant 0 : i32
    %c0_i32_1 = arith.constant 0 : i32
    return %c0_i32, %c0_i32_0 : i32, i32
  }
  func.func @transform_4(%arg0: i32) -> (i32, i32) {
    %c0_i32 = arith.constant 0 : i32
    %c0_i32_0 = arith.constant 0 : i32
    %c0_i32_1 = arith.constant 0 : i32
    return %c0_i32, %c0_i32_0 : i32, i32
  }
  func.func @transform_5(%arg0: i32) -> (i32, i32) {
    %c0_i32 = arith.constant 0 : i32
    %c0_i32_0 = arith.constant 0 : i32
    return %arg0, %c0_i32 : i32, i32
  }
  func.func @transform_6(%arg0: i32) -> (i32, i32) {
    %c0_i32 = arith.constant 0 : i32
    %c0_i32_0 = arith.constant 0 : i32
    return %arg0, %c0_i32 : i32, i32
  }
}

</mosaic_0001>

<bundles_post_ra>
// kernel: rnn_forward.1
= control target key start
LH: loop header
LB: loop body
LE: loop exit
PB: predicated region body
PF: predicated region fallthrough
CT: control target
= control target key end

     0   :  { %s683_s0 = inlined_call_operand.vmem [shape: f32[16,1], index: 0, kind: input, shape index: {}]   ;;  %s684_s1 = inlined_call_operand.vmem [shape: f32[1,20], index: 1, kind: input, shape index: {}]   ;;  %s685_s2 = inlined_call_operand.vmem [shape: f32[1,20], index: 2, kind: input, shape index: {}]   ;;  %s686_s3 = inlined_call_operand.<no memory space> [shape: f32[1,1], index: 3, kind: input, shape index: {}]   ;;  %s687_s5 = inlined_call_operand.hbm [shape: f32[16,20], index: 5, kind: output, shape index: {0}]   ;;  %s688_s6 = inlined_call_operand.vmem [shape: f32[16,1], index: 6, kind: output, shape index: {1}]   ;;  %s689_s4 = inlined_call_operand.<no memory space> [shape: f32[1,1], index: 4, kind: input, shape index: {}]  }
   0x1   :  { %v12_v0 = vstv %s686_s3  ;;  %v14_v1 = vstv %s689_s4 }
   0x2   :  { %13 = vst [vmem:[#allocation2] sm:$0x1] %v12_v0  ;;  %15 = vst [vmem:[#allocation3] sm:$0x1] %v14_v1 }
   0x3   :  { %16 = vsyncpa [#allocation5], 0 }
   0x4   :  { %18 = vsyncpa [#allocation5 + $0x1], 0  ;;  %s574_s25 = smov 0   ;;  %s576_s26 = smov 0  }
   0x5   :  { %s578_s27 = smov 0   ;;  %s580_s28 = smov 0  }
   0x6 LB: > { %s595_s3 = sadd.s32 4294967295, %s529_s28   ;;  %s409_s4 = sadd.s32 4294967294, %s529_s28   ;;  %s529_s28 = sphi %s580_s28, %s695_s28   ;;  %s525_s27 = sphi %s578_s27, %s694_s27   ;;  %s521_s26 = sphi %s576_s26, %s693_s26   ;;  %s517_s25 = sphi %s574_s25, %s692_s25  }
   0x7   : > { %s599_s29 = sadd.s32 1, %s529_s28   ;;  %s141_s30 = sadd.s32 1, %s525_s27 }
   0x8   : > { %s138_s7 = ssub.s32 %s529_s28, %s599_s29  ;;  %p151_p0 = scmp.ne.s32.totalorder %s525_s27, %s521_s26 }
   0x9   : > { %p139_p1 = scmp.eq.s32.totalorder %s138_s7, 0  ;;  %p152_p2 = scmp.eq.s32.totalorder %s595_s3, 1 }
   0xa   : > { %p157_p3 = scmp.ne.s32.totalorder %s521_s26, %s517_s25  ;;  %p158_p4 = scmp.eq.s32.totalorder %s409_s4, 1 }
   0xb   : > { %s610_s8 = scalar_select %p139_p1, %s525_s27, %s141_s30  }
   0xc   : > { %p612_p5 = por %p152_p2, %p151_p0  ;;  %p616_p6 = por %p158_p4, %p157_p3 }
   0xd   : > { %p412_p7 = scmp.ge.s32.totalorder %s529_s28, 1  ;;  %p221_p8 = scmp.lt.s32.totalorder %s529_s28, 3 }
   0xf   : > { %p222_p9 = pnand %p412_p7, %p221_p8 }
  0x10   : > { %p254_p10 = scmp.lt.s32.totalorder (!%p222_p9), %s595_s3, 1  ;;  %v531_v2 = vmov (!%p222_p9), 0   ;;  %v418_v3 = vld [vmem:[#allocation2] ss:$0 sm:$0xff] (!%p222_p9)  ;;  %v419_v4 = vld [vmem:[#allocation3] ss:$0 sm:$0xff] (!%p222_p9) }
  0x11   : > { %225 = sbr.rel (%p222_p9) target bundleno = 175 (0xaf), region = 40  ;;  %464 = vset.pattern.permute.xlu0 (!%p222_p9), %v531_v2  ;;  %vm303_vm0 = vcmask (!%p222_p9), 7168   ;;  %s245_s19 = sand.u32 (!%p222_p9), 1, %s521_s26   ;;  %v416_v9 = vld [vmem:[%s684_s1] ss:$0 sm:$0xff] (!%p222_p9)  ;;  %vm300_vm1 = vcmask (!%p222_p9), 162816  }
  0x12   : > { %s413_s20 = sshll.u32 (!%p222_p9), %s245_s19, 3  ;;  %v417_v10 = vld [vmem:[%s685_s2] ss:$0 sm:$0xff] (!%p222_p9)  ;;  %s421_s4 = sshll.u32 (!%p222_p9), %s595_s3, 7 }
  0x13   : > { %s247_s30 = scalar_lea.vmem (!%p222_p9), [#allocation4], %s413_s20  ;;  %s641_s13 = scalar_lea.hbm (!%p222_p9), %s687_s5, %s421_s4 }
  0x14   : > { %s323_s7 = sshll.u32 (!%p222_p9), %s247_s30, 4  ;;  %s306_s14 = scalar_lea.sflag (!%p222_p9), [#allocation5], %s245_s19  ;;  %s643_s7 = int_to_ptr.vmem [resolvable:$true] %s323_s7 }
  0x18   : > { %s255_s11 = scalar_select %p254_p10, %s595_s3, 1 }
  0x19   : > { %s532_s3 = smov [#allocation4]  }
  0x1a   : > { %s414_s12 = sshll.u32 %s255_s11, 3  ;;  %s471_s16 = sshll.u32 %s532_s3, 4  ;;  %s472_s16 = int_to_ptr.vmem [resolvable:$false] %s471_s16 }
  0x1b   : > { %s257_s15 = scalar_lea.vmem %s683_s0, %s414_s12  ;;  %s261_s18 = scalar_lea.vmem %s688_s6, %s414_s12 }
  0x1c   : > { %v266_v5 = vld [vmem:[%s257_s15] sm:$0xff]  ;;  %s467_s15 = scalar_lea.vmem %s643_s7, 128  ;;  %s473_s17 = scalar_lea.vmem %s472_s16, 256 }
  0x1d   : > { %269 = vperm.xlu0 %464, %v266_v5   ;;  %v292_v6 = vmul.f32 %v418_v3, %v266_v5  ;;  %p468_p11 = scmp.ne.s32.totalorder %s643_s7, %s467_s15  ;;  %p474_p0 = scmp.lt.s32.totalorder %s643_s7, %s472_s16 }
  0x1e   : > { %p475_p1 = scmp.lt.s32.totalorder %s473_s17, %s467_s15 }
  0x1f   : > { %v299_v7 = vadd.f32 %v419_v4, %v292_v6  ;;  %p469_p12 = pnand %p468_p11, %p612_p5 }
  0x20   : > { %p476_p2 = por %p475_p1, %p474_p0 }
  0x21   : > { %465 = vtanh.f32 %v299_v7  ;;  %p470_p13 = pneg %p469_p12 }
  0x23   : > { %p477_p3 = pnand %p476_p2, %p470_p13 }
  0x2b   : > { %v466_v8 = vpop.eup %465 }
  0x2c   : > { %304 = vst.msk [vmem:[%s261_s18] sm:$0xff] %vm303_vm0, %v466_v8 }
  0x9c   : > { %v270_v11 = vpop.permute.xlu0 %269 }
  0x9d   : > { %v278_v12 = vmul.f32 %v416_v9, %v270_v11 }
  0x9f   : > { %v285_v13 = vadd.f32 %v417_v10, %v278_v12 }
  0xa1   : > { %301 = vst.msk [vmem:[%s247_s30] sm:$0xff] %vm300_vm1, %v285_v13 }
  0xa2   : > { %480 = shalt.err (!%p477_p3)
}
  0xa3   : > { %s481_s18 = scalar_lea.hbm %s641_s13, 128  ;;  %s485_s21 = scalar_lea.hbm %s687_s5, 256 }
  0xa4   : > { %p482_p4 = scmp.ne.s32.totalorder %s641_s13, %s481_s18  ;;  %p486_p9 = scmp.lt.u32.totalorder %s641_s13, %s687_s5 }
  0xa5   : > { %p487_p10 = scmp.lt.u32.totalorder %s485_s21, %s481_s18  ;;  %p489_p12 = scmp.lt.u32.totalorder %s481_s18, %s641_s13 }
  0xa6   : > { %p483_p7 = pnand %p482_p4, %p612_p5 }
  0xa7   : > { %p488_p11 = por %p487_p10, %p486_p9 }
  0xa8   : > { %p484_p8 = pneg %p483_p7 }
  0xa9   : > { %p490_p13 = por %p489_p12, %p488_p11 }
  0xab   : > { %p491_p0 = pnand %p490_p13, %p484_p8 }
  0xad   : > { %494 = shalt.err (!%p491_p0)
}
  0xae   : > { %424 = dma.vmem_to_hbm [thread:$0]  (%p612_p5), %s643_s7, 128, %s641_s13, %s306_s14  }
  0xaf PF: > { %p430_p1 = scmp.ge.s32.totalorder %s529_s28, 2  ;;  %s338_s24 = sand.u32 1, %s517_s25  }
  0xb0   : > { %s339_s4 = scalar_lea.sflag [#allocation5], %s338_s24 }
  0xb1   : > { %p427_p2 = pnand %p430_p1, %p616_p6 }
  0xb3   : > { %512 = dma.done.wait (!%p427_p2), %s339_s4, 128  }
  0xb4   : > { %514 = vsyncadd (!%p427_p2), %s339_s4, 4294967168  ;;  %p21_p3 = scmp.ge.s32.totalorder %s599_s29, 4   ;;  %s692_s25 = smov %s521_s26 }
  0xb5   : > { %s693_s26 = smov %s525_s27  ;;  %s694_s27 = smov %s610_s8 }
  0xb6   : > { %s695_s28 = smov %s599_s29  ;;  %23 = sbr.rel (!%p21_p3) target bundleno = 6 (0x6), region = 87 }
  0xbd   :  { %351 = vsyncpa [#allocation5], 1 }
  0xbe   :  { %353 = vsyncpa [#allocation5 + $0x1], 1 }

</bundles_post_ra>
